<compile_context>
chip_gen: v7x
topology: tpu7x:2x2x1
jax: 0.10.0
libtpu: 0.0.40
codegen_flags: <defaults>
</compile_context>

<pallas_src>
import functools

import jax
import jax.numpy as jnp
from jax.experimental import pallas as pl
from jax.experimental.pallas import tpu as pltpu

_LANE = 128
_NUM_CORES = 2              # leading "parallel" axis (2 TCs on v7x)
_DEFAULT_BLOCK_ROWS = 2048  # ~1 MiB per f32 input tile


def _lp_loss_kernel(x_ref, t_ref, acc_ref, *, p, rows, block_rows,
                    total_steps, steps_per_core, ragged):
    j = pl.program_id(1)

    @pl.when(j == 0)
    def _():
        acc_ref[...] = jnp.zeros_like(acc_ref)

    # hot path: in-kernel cast (free VPU), sigmoid (EUP), abs-diff, pow.
    x = x_ref[...].astype(jnp.float32)
    t = t_ref[...].astype(jnp.float32)
    diff = jnp.abs(t - jax.nn.sigmoid(x))
    if p == 2:
        v = diff * diff          # VPU multiply; keep the EUP free for sigmoid
    else:
        v = diff ** p            # integer p -> lax.integer_pow (VPU)

    if ragged:
        # Mask rows outside the real data: the ragged last block and/or fully
        # redundant steps on the clamped tail of the core-split grid.
        i = pl.program_id(0)
        gstep = i * steps_per_core + j
        cstep = jnp.minimum(gstep, total_steps - 1)   # must match the index_map
        row_ids = cstep * block_rows + jax.lax.broadcasted_iota(
            jnp.int32, v.shape, 0)
        valid = (row_ids < rows) & (gstep < total_steps)
        v = jnp.where(valid, v, 0.0)

    # per-lane partial sums; single cross-lane reduce deferred to the wrapper
    acc_ref[...] += jnp.sum(v, axis=0, keepdims=True)


def lp_loss(inputs, target, p=2, size_average=True, *,
            max_block_rows=_DEFAULT_BLOCK_ROWS):
    """Pallas TPU implementation of LpLoss.forward."""
    x = inputs.reshape(-1)
    t = target.reshape(-1)
    # integer dtypes can't represent the 0.5 pad value exactly; promote them
    if not jnp.issubdtype(x.dtype, jnp.floating):
        x = x.astype(jnp.float32)
    if not jnp.issubdtype(t.dtype, jnp.floating):
        t = t.astype(jnp.float32)
    n = x.shape[0]

    # sublane granularity: 8 rows (4-byte), 16 (2-byte), 32 (1-byte)
    gran = max(32 // jnp.dtype(x.dtype).itemsize,
               32 // jnp.dtype(t.dtype).itemsize)

    rows = max(pl.cdiv(n, _LANE), gran)
    padded_n = rows * _LANE
    if padded_n != n:
        # only when numel is not lane-divisible (or tiny); pad values satisfy
        # |0.5 - sigmoid(0)| = 0 so the sum is unchanged.
        pad = padded_n - n
        x = jnp.concatenate([x, jnp.zeros((pad,), x.dtype)])
        t = jnp.concatenate([t, jnp.full((pad,), 0.5, t.dtype)])

    x2 = x.reshape(rows, _LANE)
    t2 = t.reshape(rows, _LANE)

    block_rows = max(gran, (min(max_block_rows, rows) // gran) * gran)
    total_steps = pl.cdiv(rows, block_rows)
    steps_per_core = pl.cdiv(total_steps, _NUM_CORES)
    ragged = (rows % block_rows != 0) or (steps_per_core * _NUM_CORES != total_steps)

    def in_map(i, j):
        # clamp so redundant tail steps re-read the last valid block (masked)
        return (jnp.minimum(i * steps_per_core + j, total_steps - 1), 0)

    partials = pl.pallas_call(
        functools.partial(
            _lp_loss_kernel, p=p, rows=rows, block_rows=block_rows,
            total_steps=total_steps, steps_per_core=steps_per_core,
            ragged=ragged),
        out_shape=jax.ShapeDtypeStruct((_NUM_CORES, 1, _LANE), jnp.float32),
        grid_spec=pltpu.PrefetchScalarGridSpec(
            num_scalar_prefetch=0,
            grid=(_NUM_CORES, steps_per_core),
            in_specs=[
                pl.BlockSpec((block_rows, _LANE), in_map),
                pl.BlockSpec((block_rows, _LANE), in_map),
            ],
            out_specs=pl.BlockSpec((None, 1, _LANE), lambda i, j: (i, 0, 0)),
        ),
        compiler_params=pltpu.CompilerParams(
            dimension_semantics=("parallel", "arbitrary")),
    )(x2, t2)

    # single cross-lane/cross-core reduce + p-th root (tiny; done in XLA)
    loss = jnp.sum(partials) ** (1.0 / p)
    if size_average:
        loss = loss / n
    return loss


def _lp_loss_ref(inputs, target, p=2, size_average=True):
    rec = jax.nn.sigmoid(inputs.astype(jnp.float32))
    loss = jnp.sum(jnp.abs(target.astype(jnp.float32) - rec) ** p) ** (1.0 / p)
    if size_average:
        loss = loss / target.size
    return loss


if __name__ == "__main__":
    key = jax.random.PRNGKey(0)
    k1, k2, k3, k4 = jax.random.split(key, 4)

    # primary check: NCHW f32 segmentation-style loss, p=2, size-averaged
    shape = (2, 4, 16, 16)
    logits = jax.random.normal(k1, shape, dtype=jnp.float32)
    target = (jax.random.uniform(k2, shape) > 0.5).astype(jnp.float32)
    loss = jax.block_until_ready(lp_loss(logits, target, p=2, size_average=True))
    ref = _lp_loss_ref(logits, target, p=2, size_average=True)
    assert jnp.allclose(loss, ref, rtol=1e-5, atol=1e-6), (loss, ref)

    # ragged / padded path: numel not a multiple of 128, p=3, no averaging
    shape2 = (4, 321)
    logits2 = jax.random.normal(k3, shape2, dtype=jnp.float32)
    target2 = (jax.random.uniform(k4, shape2) > 0.5).astype(jnp.float32)
    loss2 = jax.block_until_ready(
        lp_loss(logits2, target2, p=3, size_average=False, max_block_rows=8))
    ref2 = _lp_loss_ref(logits2, target2, p=3, size_average=False)
    assert jnp.allclose(loss2, ref2, rtol=1e-5, atol=1e-5), (loss2, ref2)

    # bf16 inputs go straight into the kernel (no wrapper-side f32 copy)
    logits_bf = logits.astype(jnp.bfloat16)
    target_bf = target.astype(jnp.bfloat16)
    loss3 = jax.block_until_ready(
        lp_loss(logits_bf, target_bf, p=2, size_average=True))
    ref3 = _lp_loss_ref(logits_bf, target_bf, p=2, size_average=True)
    assert jnp.allclose(loss3, ref3, rtol=1e-4, atol=1e-6), (loss3, ref3)

    print("KERNEL_OK")
</pallas_src>

<mosaic_0001>
module attributes {stable_mosaic.version = 11 : i64} {
  func.func @_lp_loss_kernel(%arg0: i32, %arg1: i32, %arg2: memref<16x128xf32, #tpu.memory_space<vmem>>, %arg3: memref<16x128xf32, #tpu.memory_space<vmem>>, %arg4: memref<1x1x128xf32, #tpu.memory_space<vmem>>) attributes {dimension_semantics = [#tpu.dimension_semantics<parallel>, #tpu.dimension_semantics<arbitrary>], iteration_bounds = array<i64: 2, 1>, scalar_prefetch = 0 : i64, scratch_operands = 0 : i64, tpu.core_type = #tpu.core_type<tc>, window_params = [{transform_indices = @transform_0, window_bounds = array<i64: 16, 128>}, {transform_indices = @transform_1, window_bounds = array<i64: 16, 128>}, {transform_indices = @transform_2, window_bounds = array<i64: 1, 1, 128>}]} {
    %c0_i32 = arith.constant 0 : i32
    %0 = arith.cmpi eq, %arg1, %c0_i32 : i32
    %1 = arith.extui %0 : i1 to i32
    %c0_i32_0 = arith.constant 0 : i32
    %2 = arith.cmpi ne, %1, %c0_i32_0 : i32
    scf.if %2 {
      %cst_15 = arith.constant 0.000000e+00 : f32
      %35 = vector.broadcast %cst_15 : f32 to vector<1x128xf32>
      %c0_16 = arith.constant 0 : index
      %c0_17 = arith.constant 0 : index
      %c0_18 = arith.constant 0 : index
      %36 = vector.load %arg4[%c0_16, %c0_17, %c0_18] : memref<1x1x128xf32, #tpu.memory_space<vmem>>, vector<1x1x128xf32>
      %37 = vector.shape_cast %36 : vector<1x1x128xf32> to vector<1x128xf32>
      %38 = vector.shape_cast %35 : vector<1x128xf32> to vector<1x1x128xf32>
      tpu.vector_store %arg4[%c0_16, %c0_17, %c0_18], %38 {strides = array<i32>} : memref<1x1x128xf32, #tpu.memory_space<vmem>>, vector<1x1x128xf32>,
    } else {
    }
    %c0 = arith.constant 0 : index
    %c0_1 = arith.constant 0 : index
    %3 = vector.load %arg2[%c0, %c0_1] : memref<16x128xf32, #tpu.memory_space<vmem>>, vector<16x128xf32>
    %c0_2 = arith.constant 0 : index
    %c0_3 = arith.constant 0 : index
    %4 = vector.load %arg3[%c0_2, %c0_3] : memref<16x128xf32, #tpu.memory_space<vmem>>, vector<16x128xf32>
    %5 = arith.negf %3 : vector<16x128xf32>
    %6 = math.exp %5 : vector<16x128xf32>
    %cst = arith.constant 1.000000e+00 : f32
    %7 = vector.broadcast %cst : f32 to vector<16x128xf32>
    %8 = arith.addf %7, %6 : vector<16x128xf32>
    %9 = arith.divf %7, %8 : vector<16x128xf32>
    %10 = arith.subf %4, %9 : vector<16x128xf32>
    %11 = math.absf %10 : vector<16x128xf32>
    %12 = arith.mulf %11, %11 : vector<16x128xf32>
    %c1_i32 = arith.constant 1 : i32
    %13 = arith.muli %arg0, %c1_i32 : i32
    %14 = arith.addi %13, %arg1 : i32
    %c0_i32_4 = arith.constant 0 : i32
    %15 = arith.minsi %14, %c0_i32_4 : i32
    %c16_i32 = arith.constant 16 : i32
    %16 = arith.muli %15, %c16_i32 : i32
    %17 = tpu.iota {dimensions = array<i32: 0>} : vector<16x128xi32>
    %18 = vector.broadcast %16 : i32 to vector<16x128xi32>
    %19 = arith.addi %18, %17 : vector<16x128xi32>
    %c16_i32_5 = arith.constant 16 : i32
    %20 = vector.broadcast %c16_i32_5 : i32 to vector<16x128xi32>
    %21 = arith.cmpi slt, %19, %20 : vector<16x128xi32>
    %c1_i32_6 = arith.constant 1 : i32
    %22 = arith.cmpi slt, %14, %c1_i32_6 : i32
    %23 = vector.broadcast %22 : i1 to vector<16x128xi1>
    %24 = arith.andi %21, %23 : vector<16x128xi1>
    %cst_7 = arith.constant 0.000000e+00 : f32
    %25 = vector.broadcast %cst_7 : f32 to vector<16x128xf32>
    %26 = arith.select %24, %12, %25 : vector<16x128xi1>, vector<16x128xf32>
    %c0_8 = arith.constant 0 : index
    %c0_9 = arith.constant 0 : index
    %c0_10 = arith.constant 0 : index
    %27 = vector.load %arg4[%c0_8, %c0_9, %c0_10] : memref<1x1x128xf32, #tpu.memory_space<vmem>>, vector<1x1x128xf32>
    %28 = vector.shape_cast %27 : vector<1x1x128xf32> to vector<1x128xf32>
    %cst_11 = arith.constant dense<0.000000e+00> : vector<128xf32>
    %29 = vector.multi_reduction <add>, %26, %cst_11 [0] : vector<16x128xf32> to vector<128xf32>
    %30 = vector.shape_cast %29 : vector<128xf32> to vector<1x128xf32>
    %31 = arith.addf %28, %30 : vector<1x128xf32>
    %c0_12 = arith.constant 0 : index
    %c0_13 = arith.constant 0 : index
    %c0_14 = arith.constant 0 : index
    %32 = vector.load %arg4[%c0_12, %c0_13, %c0_14] : memref<1x1x128xf32, #tpu.memory_space<vmem>>, vector<1x1x128xf32>
    %33 = vector.shape_cast %32 : vector<1x1x128xf32> to vector<1x128xf32>
    %34 = vector.shape_cast %31 : vector<1x128xf32> to vector<1x1x128xf32>
    tpu.vector_store %arg4[%c0_12, %c0_13, %c0_14], %34 {strides = array<i32>} : memref<1x1x128xf32, #tpu.memory_space<vmem>>, vector<1x1x128xf32>,
    return
  }
  func.func @transform_0(%arg0: i32, %arg1: i32) -> (i32, i32) {
    %c1_i32 = arith.constant 1 : i32
    %0 = arith.muli %arg0, %c1_i32 : i32
    %1 = arith.addi %0, %arg1 : i32
    %c0_i32 = arith.constant 0 : i32
    %2 = arith.minsi %1, %c0_i32 : i32
    %c0_i32_0 = arith.constant 0 : i32
    %c0_i32_1 = arith.constant 0 : i32
    return %2, %c0_i32_0 : i32, i32
  }
  func.func @transform_1(%arg0: i32, %arg1: i32) -> (i32, i32) {
    %c1_i32 = arith.constant 1 : i32
    %0 = arith.muli %arg0, %c1_i32 : i32
    %1 = arith.addi %0, %arg1 : i32
    %c0_i32 = arith.constant 0 : i32
    %2 = arith.minsi %1, %c0_i32 : i32
    %c0_i32_0 = arith.constant 0 : i32
    %c0_i32_1 = arith.constant 0 : i32
    return %2, %c0_i32_0 : i32, i32
  }
  func.func @transform_2(%arg0: i32, %arg1: i32) -> (i32, i32, i32) {
    %c0_i32 = arith.constant 0 : i32
    %c0_i32_0 = arith.constant 0 : i32
    %c0_i32_1 = arith.constant 0 : i32
    return %arg0, %c0_i32, %c0_i32_0 : i32, i32, i32
  }
}

</mosaic_0001>

<bundles_post_ra>
// kernel: tpu_custom_call.1
= control target key start
LH: loop header
LB: loop body
LE: loop exit
PB: predicated region body
PF: predicated region fallthrough
CT: control target
= control target key end

     0   :  { %7 = vsyncpa [#allocation3], 0  ;;  %s939_s0 = inlined_call_operand.hbm [shape: f32[16,128], index: 0, kind: input, shape index: {}]   ;;  %s940_s1 = inlined_call_operand.hbm [shape: f32[16,128], index: 1, kind: input, shape index: {}]   ;;  %s941_s2 = inlined_call_operand.hbm [shape: f32[2,1,128], index: 2, kind: output, shape index: {}]  }
   0x1   :  { %9 = vsyncpa [#allocation3 + $0x1], 0 }
   0x2   :  { %10 = vsyncpa [#allocation6], 0 }
   0x3   :  { %12 = vsyncpa [#allocation6 + $0x1], 0 }
   0x4   :  { %13 = vsyncpa [#allocation4], 0 }
   0x5   :  { %15 = vsyncpa [#allocation4 + $0x1], 0  ;;  %s719_s9 = smov 0   ;;  %s721_s10 = smov 0  }
   0x6   :  { %s723_s11 = smov 0   ;;  %s725_s12 = smov 0  }
   0x7   :  { %s727_s13 = smov 0   ;;  %s729_s14 = smov 0  }
   0x8   :  { %s731_s15 = smov 0   ;;  %s733_s16 = smov 0  }
   0x9 LB: > { %s406_s17 = sadd.s32 4294967295, %s696_s16   ;;  %s407_s18 = sadd.s32 4294967294, %s696_s16   ;;  %s696_s16 = sphi %s733_s16, %s21_s16   ;;  %s692_s15 = sphi %s731_s15, %s960_s15   ;;  %s688_s14 = sphi %s729_s14, %s959_s14   ;;  %s684_s13 = sphi %s727_s13, %s929_s13   ;;  %s680_s12 = sphi %s725_s12, %s958_s12   ;;  %s676_s11 = sphi %s723_s11, %s957_s11   ;;  %s672_s10 = sphi %s721_s10, %s956_s10   ;;  %s668_s9 = sphi %s719_s9, %s955_s9  }
   0xa   : > { %s33_s19 = sadd.s32 1, %s692_s15  ;;  %p665_p1 = scmp.ne.s32.totalorder %s684_s13, 0 }
   0xb   : > { %p35_p0 = scmp.ge.s32.totalorder %s33_s19, 2  ;;  %p54_p2 = scmp.eq.s32.totalorder %s696_s16, 0 }
   0xc   : > { %p59_p3 = scmp.ne.s32.totalorder %s684_s13, %s680_s12  ;;  %p60_p5 = scmp.eq.s32.totalorder %s406_s17, 0 }
   0xd   : > { %s962_s19 = smov (%p35_p0, %s33_s19), 0  ;;  %p765_p4 = por %p665_p1, %p54_p2 }
   0xe   : > { %p769_p6 = por %p60_p5, %p59_p3  ;;  %s101_s22 = ssub.s32 %s692_s15, %s962_s19 }
   0xf   : > { %p102_p7 = scmp.eq.s32.totalorder %s101_s22, 0  ;;  %s104_s23 = sadd.s32 1, %s676_s11 }
  0x10   : > { %s945_s21 = scalar_select %p769_p6, 1, 0 }
  0x11   : > { %s777_s24 = scalar_select %p102_p7, %s676_s11, %s104_s23  }
  0x12   : > { %p114_p8 = scmp.ne.s32.totalorder %s676_s11, %s672_s10  ;;  %p115_p9 = scmp.eq.s32.totalorder %s406_s17, 1 }
  0x13   : > { %p120_p10 = scmp.ne.s32.totalorder %s672_s10, %s668_s9  ;;  %p121_p11 = scmp.eq.s32.totalorder %s407_s18, 1 }
  0x14   : > { %p783_p12 = por %p115_p9, %p114_p8  ;;  %p444_p1 = scmp.lt.s32.totalorder %s696_s16, 2 }
  0x15   : > { %p788_p0 = por %p121_p11, %p120_p10  ;;  %s698_s27 = smov [#allocation2]  }
  0x16   : > { %s946_s25 = scalar_select %p783_p12, 1, 0 }
  0x17   : > { %s947_s26 = scalar_select %p788_p0, 1, 0 }
  0x18   : > { %s155_s28 = sshll.u32 %s698_s27, 4  ;;  %p795_p2 = pnand %p444_p1, %p765_p4  ;;  %s156_s28 = int_to_ptr.vmem [resolvable:$true] %s155_s28 }
  0x19   : > { %s529_s4 = scalar_lea.hbm %s939_s0, 256 }
  0x1a   : > { %p530_p3 = scmp.ne.s32.totalorder %s939_s0, %s529_s4  ;;  %p531_p5 = pneg %p795_p2 }
  0x1b   : > { %p536_p8 = scmp.lt.u32.totalorder %s529_s4, %s529_s4  ;;  %p538_p9 = scmp.lt.u32.totalorder %s529_s4, %s939_s0 }
  0x1c   : > { %p532_p7 = pnand %p531_p5, %p530_p3 }
  0x1d   : > { %p539_p10 = por %p538_p9, %p536_p8 }
  0x1e   : > { %p533_p4 = pneg %p532_p7 }
  0x20   : > { %p540_p11 = pnand %p539_p10, %p533_p4 }
  0x22   : > { %543 = shalt.err (!%p540_p11)
}
  0x23   : > { %s544_s12 = scalar_lea.vmem %s156_s28, 256  ;;  %s551_s17 = scalar_lea.vmem %s156_s28, 512 }
  0x24   : > { %p545_p1 = scmp.ne.s32.totalorder %s156_s28, %s544_s12  ;;  %p552_p12 = scmp.lt.s32.totalorder %s156_s28, %s156_s28 }
  0x25   : > { %p553_p6 = scmp.lt.s32.totalorder %s551_s17, %s544_s12 }
  0x26   : > { %p547_p13 = pnand %p545_p1, %p531_p5 }
  0x27   : > { %p554_p3 = por %p553_p6, %p552_p12 }
  0x28   : > { %p548_p0 = pneg %p547_p13 }
  0x2a   : > { %p555_p7 = pnand %p554_p3, %p548_p0 }
  0x2c   : > { %558 = shalt.err (!%p555_p7)
}
  0x2d   : > { %s699_s18 = smov 128   ;;  %s700_s20 = smov 8  }
  0x2e   : > { %436 = dma.hbm_to_vmem [thread:$0]  (!%p795_p2), %s939_s0, 256, %s156_s28, [#allocation3], %s699_s18, %s699_s18, %s700_s20  }
  0x2f   : > { %p416_p13 = scmp.ge.s32.totalorder %s696_s16, 1  ;;  %p187_p4 = scmp.lt.s32.totalorder %s696_s16, 3 }
  0x30   : > { %s701_s30 = smov [#allocation5]   ;;  %s559_s6 = scalar_lea.hbm %s940_s1, 256 }
  0x31   : > { %p826_p8 = pnand %p416_p13, %p187_p4  ;;  %s179_s3 = sshll.u32 %s701_s30, 4  ;;  %s180_s3 = int_to_ptr.vmem [resolvable:$true] %s179_s3 }
  0x32   : > { %p560_p6 = scmp.ne.s32.totalorder %s940_s1, %s559_s6  ;;  %p566_p9 = scmp.lt.u32.totalorder %s559_s6, %s559_s6 }
  0x33   : > { %s949_s27 = scalar_select %p826_p8, 1, 0 }
  0x34   : > { %p562_p12 = pnand %p560_p6, %p531_p5  ;;  %p568_p10 = scmp.lt.u32.totalorder %s559_s6, %s940_s1 }
  0x36   : > { %p563_p0 = pneg %p562_p12  ;;  %p569_p11 = por %p568_p10, %p566_p9 }
  0x38   : > { %p570_p1 = pnand %p569_p11, %p563_p0 }
  0x3a   : > { %573 = shalt.err (!%p570_p1)
}
  0x3b   : > { %s574_s17 = scalar_lea.vmem %s180_s3, 256  ;;  %s581_s22 = scalar_lea.vmem %s180_s3, 512 }
  0x3c   : > { %p575_p3 = scmp.ne.s32.totalorder %s180_s3, %s574_s17  ;;  %p582_p4 = scmp.lt.s32.totalorder %s180_s3, %s180_s3 }
  0x3d   : > { %p583_p8 = scmp.lt.s32.totalorder %s581_s22, %s574_s17 }
  0x3e   : > { %p577_p7 = pnand %p575_p3, %p531_p5 }
  0x3f   : > { %p584_p6 = por %p583_p8, %p582_p4 }
  0x40   : > { %p578_p13 = pneg %p577_p7 }
  0x42   : > { %p585_p12 = pnand %p584_p6, %p578_p13 }
  0x44   : > { %588 = shalt.err (!%p585_p12)
}
  0x45   : > { %439 = dma.hbm_to_vmem [thread:$0]  (!%p795_p2), %s940_s1, 256, %s180_s3, [#allocation6], %s699_s18, %s699_s18, %s700_s20  }
  0x46   : > { %p950_p0 = scmp.ne.s32.totalorder %s949_s27, 0 }
  0x47   : > { %s193_s4 = sand.u32 (!%p950_p0), 1, %s684_s13   ;;  %p951_p5 = scmp.ne.s32.totalorder (!%p950_p0), %s945_s21, 0 }
  0x48   : > { %191 = sbr.rel (%p950_p0) target bundleno = 147 (0x93), region = 28  ;;  %s417_s5 = sshll.u32 (!%p950_p0), %s193_s4, 4 }
  0x49   : > { %s194_s6 = scalar_lea.sflag (!%p950_p0), [#allocation3], %s193_s4  ;;  %s197_s7 = scalar_lea.vmem (!%p950_p0), [#allocation2], %s417_s5 }
  0x4f   : > { %654 = dma.done.wait (%p951_p5), %s194_s6, 256  }
  0x50   : > { %656 = vsyncadd (%p951_p5), %s194_s6, 4294967040  ;;  %s203_s29 = scalar_lea.sflag [#allocation6], %s193_s4  ;;  %s860_s8 = scalar_lea.vmem [#allocation5], %s417_s5 }
  0x51   : > { %658 = dma.done.wait (%p951_p5), %s203_s29, 256  }
  0x52   : > { %660 = vsyncadd (%p951_p5), %s203_s29, 4294967040  ;;  %s229_s18 = sand.u32 1, %s672_s10   ;;  %v702_v0 = vmov 0.0   ;;  %v244_v1 = vld [vmem:[%s197_s7] sm:$0xff]  ;;  %v245_v2 = vld [vmem:[%s197_s7 + $0x8] sm:$0xff]  ;;  %p267_p2 = scmp.lt.s32.totalorder %s688_s14, 0  ;;  %v270_v5 = vlaneseq }
  0x53   : > { %s869_s20 = scalar_lea.vmem [#allocation7], %s229_s18  ;;  %v419_v3 = vmul.f32 -1.442695, %v244_v1  ;;  %v420_v4 = vmul.f32 -1.442695, %v245_v2  ;;  %p278_p8 = scmp.lt.s32.totalorder %s688_s14, 1 }
  0x54   : > { %243 = vst [vmem:[%s869_s20] sm:$0x1] %v702_v0  ;;  %s268_s21 = scalar_select %p267_p2, %s688_s14, 0  ;;  %v271_v10 = vshrl.u32 %v270_v5, 7  ;;  %v246_v14 = vld [vmem:[%s860_s8] sm:$0xff]  ;;  %v247_v17 = vld [vmem:[%s860_s8 + $0x8] sm:$0xff] }
  0x55   : > { %521 = vpow2.f32 %v419_v3  ;;  %s279_s3 = scalar_select %p278_p8, 1, 0 }
  0x56   : > { %523 = vpow2.f32 %v420_v4  ;;  %s421_s27 = sshll.u32 %s268_s21, 4  ;;  %v272_v11 = vadd.s32 8, %v271_v10  ;;  %s422_s28 = sshll.u32 %s688_s14, 4 }
  0x57   : > { %v273_v12 = vstv %s421_s27  ;;  %v280_v16 = vstv %s279_s3  ;;  %s309_s12 = sshll.u32 %s869_s20, 4  ;;  %s883_s23 = scalar_lea.hbm %s941_s2, %s422_s28  ;;  %s885_s12 = int_to_ptr.vmem [resolvable:$true] %s309_s12 }
  0x58   : > { %v274_v13 = vadd.s32 %v273_v12, %v271_v10  ;;  %v275_v15 = vadd.s32 %v273_v12, %v272_v11  ;;  %vm281_vm1 = vcmp.eq.s32.totalorder %v280_v16, 1  ;;  %s297_s30 = scalar_lea.sflag [#allocation4], %s229_s18  ;;  %s589_s4 = scalar_lea.vmem %s885_s12, 16 }
  0x59   : > { %p590_p9 = scmp.ne.s32.totalorder %s885_s12, %s589_s4  ;;  %p952_p10 = scmp.ne.s32.totalorder %s946_s25, 0 }
  0x5a   : > { %vm276_vm0 = vcmp.lt.s32.totalorder %v274_v13, 16  ;;  %vm277_vm2 = vcmp.lt.s32.totalorder %v275_v15, 16  ;;  %s703_s14 = smov [#allocation7]  }
  0x5b   : > { %vm282_vm3 = vmand %vm276_vm0, %vm281_vm1  ;;  %v286_v34 = vld [vmem:[%s869_s20] sm:$0x1]  ;;  %p591_p11 = pnand %p590_p9, %p952_p10  ;;  %s593_s5 = sshll.u32 %s703_s14, 4  ;;  %s594_s5 = int_to_ptr.vmem [resolvable:$false] %s593_s5 }
  0x5c   : > { %vm283_vm4 = vmand %vm277_vm2, %vm281_vm1  ;;  %s595_s6 = scalar_lea.vmem %s594_s5, 32  ;;  %p596_p3 = scmp.lt.s32.totalorder %s885_s12, %s594_s5 }
  0x5d   : > { %p592_p1 = pneg %p591_p11  ;;  %p597_p7 = scmp.lt.s32.totalorder %s595_s6, %s589_s4 }
  0x5f   : > { %v522_v6 = vpop.eup %521  ;;  %p598_p13 = por %p597_p7, %p596_p3 }
  0x60   : > { %v524_v7 = vpop.eup %523  ;;  %v254_v8 = vadd.f32 1.0, %v522_v6 }
  0x61   : > { %v255_v9 = vadd.f32 1.0, %v524_v7  ;;  %p599_p4 = pnand %p598_p13, %p592_p1 }
  0x62   : > { %525 = vrcp.f32 %v254_v8 }
  0x63   : > { %527 = vrcp.f32 %v255_v9 }
  0x6c   : > { %v526_v18 = vpop.eup %525 }
  0x6d   : > { %v528_v19 = vpop.eup %527  ;;  %v260_v20 = vsub.f32 %v246_v14, %v526_v18 }
  0x6e   : > { %v261_v21 = vsub.f32 %v247_v17, %v528_v19 }
  0x6f   : > { %v262_v22 = vand.u32 2147483647, %v260_v20 }
  0x70   : > { %v263_v23 = vand.u32 2147483647, %v261_v21 }
  0x71   : > { %v264_v24 = vmul.f32 %v262_v22, %v262_v22 }
  0x72   : > { %v265_v25 = vmul.f32 %v263_v23, %v263_v23 }
  0x73   : > { %v284_v26 = vsel %vm282_vm3, %v264_v24, 0.0 }
  0x74   : > { %v285_v27 = vsel %vm283_vm4, %v265_v25, 0.0 }
  0x75   : > { %v287_v28 = vadd.f32 %v285_v27, %v284_v26 }
  0x77   : > { %v288_v29 = vrot.slane %v287_v28, 4 }
  0x79   : > { %v289_v30 = vadd.f32 %v288_v29, %v287_v28 }
  0x7b   : > { %v290_v31 = vrot.slane %v289_v30, 2 }
  0x7d   : > { %v291_v32 = vadd.f32 %v290_v31, %v289_v30 }
  0x7f   : > { %v292_v33 = vrot.slane %v291_v32, 1 }
  0x81   : > { %v293_v35 = vadd.f32 %v292_v33, %v291_v32 }
  0x83   : > { %v294_v36 = vadd.f32 %v293_v35, %v286_v34 }
  0x85   : > { %295 = vst [vmem:[%s869_s20] sm:$0x1] %v294_v36 }
  0x86   : > { %602 = shalt.err (!%p599_p4)
}
  0x87   : > { %s603_s7 = scalar_lea.hbm %s883_s23, 16  ;;  %s607_s18 = scalar_lea.hbm %s941_s2, 32 }
  0x88   : > { %p604_p6 = scmp.ne.s32.totalorder %s883_s23, %s603_s7  ;;  %p608_p5 = scmp.lt.u32.totalorder %s883_s23, %s941_s2 }
  0x89   : > { %p609_p2 = scmp.lt.u32.totalorder %s607_s18, %s603_s7  ;;  %p611_p9 = scmp.lt.u32.totalorder %s603_s7, %s883_s23 }
  0x8a   : > { %p605_p12 = pnand %p604_p6, %p952_p10 }
  0x8b   : > { %p610_p8 = por %p609_p2, %p608_p5 }
  0x8c   : > { %p606_p0 = pneg %p605_p12 }
  0x8d   : > { %p612_p11 = por %p611_p9, %p610_p8 }
  0x8f   : > { %p613_p1 = pnand %p612_p11, %p606_p0 }
  0x91   : > { %616 = shalt.err (!%p613_p1)
}
  0x92   : > { %431 = dma.vmem_to_hbm [thread:$0]  (%p952_p10), %s885_s12, 16, %s883_s23, %s297_s30  }
  0x93 PF: > { %s321_s27 = sand.u32 1, %s668_s9   ;;  %p953_p3 = scmp.ne.s32.totalorder %s947_s26, 0 }
  0x94   : > { %p954_p7 = scmp.ge.s32.totalorder %s696_s16, 2  ;;  %s322_s3 = scalar_lea.sflag [#allocation4], %s321_s27 }
  0x96   : > { %p441_p13 = pnand %p954_p7, %p953_p3 }
  0x98   : > { %662 = dma.done.wait (!%p441_p13), %s322_s3, 16  }
  0x99   : > { %664 = vsyncadd (!%p441_p13), %s322_s3, 4294967280  ;;  %s21_s16 = sadd.s32 1, %s696_s16   ;;  %s955_s9 = smov %s672_s10 }
  0x9a   : > { %p18_p4 = scmp.ge.s32.totalorder %s21_s16, 4   ;;  %s956_s10 = smov %s676_s11 }
  0x9b   : > { %s957_s11 = smov %s777_s24  ;;  %s958_s12 = smov %s684_s13 }
  0x9c   : > { %s929_s13 = smov 0   ;;  %s959_s14 = smov %s692_s15 }
  0x9d   : > { %s960_s15 = smov %s962_s19  ;;  %20 = sbr.rel (!%p18_p4) target bundleno = 9 (0x9), region = 90 }
  0xa4   :  { %326 = vsyncpa [#allocation3], 1 }
  0xa5   :  { %328 = vsyncpa [#allocation3 + $0x1], 1 }
  0xa6   :  { %329 = vsyncpa [#allocation6], 1 }
  0xa7   :  { %331 = vsyncpa [#allocation6 + $0x1], 1 }
  0xa8   :  { %332 = vsyncpa [#allocation4], 1 }
  0xa9   :  { %334 = vsyncpa [#allocation4 + $0x1], 1 }

</bundles_post_ra>
